<compile_context>
chip_gen: v7x
topology: tpu7x:2x2x1
jax: 0.10.0
libtpu: 0.0.40
codegen_flags: <defaults>
</compile_context>

<pallas_src>
import functools

import numpy as np
import jax
import jax.numpy as jnp
from jax.experimental import pallas as pl
from jax.experimental.pallas import tpu as pltpu


_NEG_PAD = -1.0e9                 # pad logit -> exactly zero focal / dice contribution
_VMEM_LIMIT = 48 * 1024 * 1024    # safe on v5e/v6e (128 MiB) and v7x (64 MiB) VMEM
_MAX_TILE_BYTES = 2 * 1024 * 1024 # per-input tile budget (x2 inputs x2 pipeline bufs)


def _round_up(x, m):
    return ((x + m - 1) // m) * m


def _row_tiling(rows, cols, max_tile_bytes=_MAX_TILE_BYTES):
    """Pick a row block (multiple of 8, VMEM-budgeted) and the padded row count."""
    rb = _round_up(min(max(rows, 1), 512), 8)
    while rb > 8 and rb * cols * 4 > max_tile_bytes:
        rb = max(8, (rb // 2 // 8) * 8)
    rows_pad = _round_up(max(rows, 1), rb)
    return rb, rows_pad


# ----------------------------------------------------------------------------
# Shared focal-loss math (2 transcendentals / element: exp + log, recip on EUP)
# ----------------------------------------------------------------------------
def _focal_terms(x, t, alpha, gamma):
    """Element-wise sigmoid focal loss and sigmoid probability (shared exp)."""
    e = jnp.exp(-jnp.abs(x))                       # exp(-|x|), computed once
    r = pl.reciprocal(1.0 + e, approx=True)        # EUP vrcp (free-ish slot)
    p = jnp.where(x >= 0.0, r, e * r)              # sigmoid(x) from shared e
    # TODO(synk): jnp.log1p would be slightly more precise; plain log kept for
    # guaranteed Mosaic lowering (error < 1e-7 on the loss, negligible).
    ce = jnp.maximum(x, 0.0) - x * t + jnp.log(1.0 + e)
    p_t = p * t + (1.0 - p) * (1.0 - t)
    om = 1.0 - p_t
    mod = om * om if float(gamma) == 2.0 else om ** gamma
    loss = ce * mod
    if alpha >= 0:
        loss = (alpha * t + (1.0 - alpha) * (1.0 - t)) * loss
    return loss, p


# ----------------------------------------------------------------------------
# Kernel 1: classification focal loss (one-hot built on-chip, row-tiled)
# ----------------------------------------------------------------------------
def _focal_cls_kernel(x_ref, ids_ref, out_ref, *, alpha, gamma):
    @pl.when(pl.program_id(0) == 0)
    def _():
        out_ref[...] = jnp.zeros_like(out_ref)

    x = x_ref[...].astype(jnp.float32)             # (rb, C)
    ids = ids_ref[...]                             # (rb, 1) int32
    rb, C = x.shape
    col = jax.lax.broadcasted_iota(jnp.int32, (rb, C), 1)
    t = (col == ids).astype(jnp.float32)           # on-chip one-hot (no-object -> all zero)

    loss, _ = _focal_terms(x, t, alpha, gamma)
    out_ref[...] += jnp.sum(jnp.sum(loss, axis=1, keepdims=True), axis=0, keepdims=True)


def _focal_cls_call(logits2d, class_ids, alpha, gamma, num_classes):
    """logits2d: [R, C]; class_ids: [R] int32 in [0, num_classes]. Returns total sum."""
    R, C = logits2d.shape
    rb, R_pad = _row_tiling(R, C)
    x = jnp.pad(logits2d, ((0, R_pad - R), (0, 0)), constant_values=_NEG_PAD)
    ids = jnp.pad(jnp.asarray(class_ids, dtype=jnp.int32), (0, R_pad - R),
                  constant_values=num_classes).reshape(R_pad, 1)
    out = pl.pallas_call(
        functools.partial(_focal_cls_kernel, alpha=float(alpha), gamma=float(gamma)),
        grid=(R_pad // rb,),
        in_specs=[pl.BlockSpec((rb, C), lambda i: (i, 0)),
                  pl.BlockSpec((rb, 1), lambda i: (i, 0))],
        out_specs=pl.BlockSpec((1, 1), lambda i: (0, 0)),
        out_shape=jax.ShapeDtypeStruct((1, 1), jnp.float32),
        compiler_params=pltpu.CompilerParams(
            dimension_semantics=("arbitrary",),        # accumulator axis
            vmem_limit_bytes=_VMEM_LIMIT),
    )(x, ids)
    return out[0, 0]


# ----------------------------------------------------------------------------
# Kernel 2: FUSED mask focal + dice loss (single pass, single sigmoid)
# ----------------------------------------------------------------------------
def _mask_loss_kernel(x_ref, t_ref, focal_ref, dice_ref, *,
                      alpha, gamma, n_rows, row_block):
    i = pl.program_id(0)

    @pl.when(i == 0)
    def _():
        focal_ref[...] = jnp.zeros_like(focal_ref)
        dice_ref[...] = jnp.zeros_like(dice_ref)

    x = x_ref[...].astype(jnp.float32)             # (rb, HW_pad)
    t = t_ref[...].astype(jnp.float32)

    loss, p = _focal_terms(x, t, alpha, gamma)     # sigmoid computed once, shared
    focal_ref[...] += jnp.sum(jnp.sum(loss, axis=1, keepdims=True), axis=0, keepdims=True)

    # dice: each row tile contains the full flattened mask of its boxes
    num = 2.0 * jnp.sum(p * t, axis=1, keepdims=True)                       # (rb, 1)
    den = jnp.sum(p, axis=1, keepdims=True) + jnp.sum(t, axis=1, keepdims=True)
    dice = 1.0 - (num + 1.0) * pl.reciprocal(den + 1.0, approx=True)        # (rb, 1)
    row = i * row_block + jax.lax.broadcasted_iota(jnp.int32, dice.shape, 0)
    rvalid = (row < n_rows).astype(jnp.float32)
    dice_ref[...] += jnp.sum(dice * rvalid, axis=0, keepdims=True)


def _mask_loss_call(mask_logits, mask_targets, alpha, gamma):
    """mask_logits/targets: [M, HW]. Returns (focal_sum, dice_sum) scalars."""
    M, HW = mask_logits.shape
    HW_pad = _round_up(HW, 128)                    # lane-dense last dim
    rb, M_pad = _row_tiling(M, HW_pad)
    x = jnp.pad(mask_logits, ((0, M_pad - M), (0, HW_pad - HW)), constant_values=_NEG_PAD)
    t = jnp.pad(mask_targets, ((0, M_pad - M), (0, HW_pad - HW)))
    focal, dice = pl.pallas_call(
        functools.partial(_mask_loss_kernel, alpha=float(alpha), gamma=float(gamma),
                          n_rows=int(M), row_block=int(rb)),
        grid=(M_pad // rb,),
        in_specs=[pl.BlockSpec((rb, HW_pad), lambda i: (i, 0)),
                  pl.BlockSpec((rb, HW_pad), lambda i: (i, 0))],
        out_specs=(pl.BlockSpec((1, 1), lambda i: (0, 0)),
                   pl.BlockSpec((1, 1), lambda i: (0, 0))),
        out_shape=(jax.ShapeDtypeStruct((1, 1), jnp.float32),
                   jax.ShapeDtypeStruct((1, 1), jnp.float32)),
        compiler_params=pltpu.CompilerParams(
            dimension_semantics=("arbitrary",),
            vmem_limit_bytes=_VMEM_LIMIT),
    )(x, t)
    return focal[0, 0], dice[0, 0]


# ----------------------------------------------------------------------------
# Kernel 3: paired box losses, boxes in lane-dense (4, N_pad) layout
# ----------------------------------------------------------------------------
def _box_loss_kernel(s_ref, t_ref, l1_ref, giou_ref, xy_ref, hw_ref, *, n_boxes):
    s = s_ref[...].astype(jnp.float32)             # (4, Np) rows = cx, cy, w, h
    t = t_ref[...].astype(jnp.float32)
    Np = s.shape[1]
    valid = (jax.lax.broadcasted_iota(jnp.int32, (1, Np), 1) < n_boxes).astype(jnp.float32)

    l1 = jnp.abs(s - t) * valid                                            # (4, Np)
    l1_ref[...] = jnp.sum(jnp.sum(l1, axis=1, keepdims=True), axis=0, keepdims=True)
    xy_ref[...] = jnp.sum(jnp.sum(l1[0:2, :], axis=1, keepdims=True), axis=0, keepdims=True)
    hw_ref[...] = jnp.sum(jnp.sum(l1[2:4, :], axis=1, keepdims=True), axis=0, keepdims=True)

    def xyxy(b):
        cx, cy, w, h = b[0:1, :], b[1:2, :], b[2:3, :], b[3:4, :]
        return cx - 0.5 * w, cy - 0.5 * h, cx + 0.5 * w, cy + 0.5 * h

    sx0, sy0, sx1, sy1 = xyxy(s)
    tx0, ty0, tx1, ty1 = xyxy(t)
    area_s = (sx1 - sx0) * (sy1 - sy0)
    area_t = (tx1 - tx0) * (ty1 - ty0)

    ix0, iy0 = jnp.maximum(sx0, tx0), jnp.maximum(sy0, ty0)
    ix1, iy1 = jnp.minimum(sx1, tx1), jnp.minimum(sy1, ty1)
    inter = jnp.maximum(ix1 - ix0, 0.0) * jnp.maximum(iy1 - iy0, 0.0)
    union = area_s + area_t - inter
    iou = inter * pl.reciprocal(jnp.maximum(union, 1e-12), approx=True)

    ex0, ey0 = jnp.minimum(sx0, tx0), jnp.minimum(sy0, ty0)
    ex1, ey1 = jnp.maximum(sx1, tx1), jnp.maximum(sy1, ty1)
    earea = (ex1 - ex0) * (ey1 - ey0)
    giou = iou - (earea - union) * pl.reciprocal(jnp.maximum(earea, 1e-12), approx=True)
    giou_ref[...] = jnp.sum((1.0 - giou) * valid, axis=1, keepdims=True)   # (1, 1)


def _box_loss_call(src_boxes, tgt_boxes):
    """src/tgt boxes: [N, 4] cxcywh. Returns (l1_sum, giou_loss_sum, xy_sum, hw_sum)."""
    N = src_boxes.shape[0]
    N_pad = max(128, _round_up(max(N, 1), 128))
    dummy = jnp.full((4, 1), 0.5, dtype=jnp.float32)       # identical pad box -> 0 loss

    def prep(b):
        bt = jnp.asarray(b, dtype=jnp.float32).T           # (4, N)
        if N_pad > N:
            bt = jnp.concatenate([bt, jnp.tile(dummy, (1, N_pad - N))], axis=1)
        return bt

    outs = pl.pallas_call(
        functools.partial(_box_loss_kernel, n_boxes=int(N)),
        grid=(1,),
        in_specs=[pl.BlockSpec((4, N_pad), lambda i: (0, 0)),
                  pl.BlockSpec((4, N_pad), lambda i: (0, 0))],
        out_specs=tuple(pl.BlockSpec((1, 1), lambda i: (0, 0)) for _ in range(4)),
        out_shape=tuple(jax.ShapeDtypeStruct((1, 1), jnp.float32) for _ in range(4)),
        compiler_params=pltpu.CompilerParams(
            dimension_semantics=("arbitrary",),
            vmem_limit_bytes=_VMEM_LIMIT),
    )(prep(src_boxes), prep(tgt_boxes))
    return tuple(o[0, 0] for o in outs)


# ----------------------------------------------------------------------------
# SetCriterion
# ----------------------------------------------------------------------------
class SetCriterion:
    def __init__(self, num_classes, matcher, weight_dict, focal_alpha, gamma,
                 losses, image_size):
        self.num_classes = num_classes
        self.matcher = matcher
        self.weight_dict = weight_dict
        self.losses = losses
        self.focal_alpha = focal_alpha
        self.gamma = gamma
        self.image_size = image_size

    # ---- permutation helpers (host-side, deterministic) ----
    @staticmethod
    def _get_src_permutation_idx(indices):
        batch_idx = np.concatenate(
            [np.full(len(src), i, dtype=np.int64) for i, (src, _) in enumerate(indices)])
        src_idx = np.concatenate([np.asarray(src, dtype=np.int64) for src, _ in indices])
        return batch_idx, src_idx

    @staticmethod
    def _get_tgt_permutation_idx(indices):
        batch_idx = np.concatenate(
            [np.full(len(tgt), i, dtype=np.int64) for i, (_, tgt) in enumerate(indices)])
        tgt_idx = np.concatenate([np.asarray(tgt, dtype=np.int64) for _, tgt in indices])
        return batch_idx, tgt_idx

    # ---- individual losses ----
    def loss_labels(self, outputs, targets, indices, num_boxes, log=True):
        src_logits = outputs['pred_logits']                                 # [B, Q, C]
        B, Q, C = src_logits.shape

        target_classes = np.full((B, Q), self.num_classes, dtype=np.int32)
        labels_o = []
        for b, (src, tgt) in enumerate(indices):
            lbl = np.asarray(targets[b]['labels'])[np.asarray(tgt, dtype=np.int64)]
            target_classes[b, np.asarray(src, dtype=np.int64)] = lbl
            labels_o.append(lbl)
        target_classes_o = np.concatenate(labels_o).astype(np.int64)

        # one-hot (with the no-object class dropped) is built INSIDE the kernel
        total = _focal_cls_call(src_logits.reshape(B * Q, C),
                                target_classes.reshape(B * Q),
                                self.focal_alpha, self.gamma, self.num_classes)
        # reference: sigmoid_focal_loss(...) * Q  ==  total_sum / num_boxes
        loss_ce = total / num_boxes
        losses = {'loss_ce': loss_ce}
        if log:
            batch_idx, src_idx = self._get_src_permutation_idx(indices)
            matched_logits = src_logits[batch_idx, src_idx]                 # [M, C]
            pred = jnp.argmax(matched_logits, axis=-1)
            acc = jnp.mean((pred == jnp.asarray(target_classes_o)).astype(jnp.float32)) * 100.0
            losses['class_error'] = 100.0 - acc
        return losses

    def loss_cardinality(self, outputs, targets, indices, num_boxes):
        pred_logits = outputs['pred_logits']
        tgt_lengths = jnp.asarray([len(t['labels']) for t in targets], dtype=jnp.float32)
        card_pred = jnp.sum(
            (jnp.argmax(pred_logits, axis=-1) != pred_logits.shape[-1] - 1).astype(jnp.float32),
            axis=1)
        card_err = jnp.mean(jnp.abs(card_pred - tgt_lengths))
        return {'cardinality_error': card_err}

    def loss_boxes(self, outputs, targets, indices, num_boxes):
        batch_idx, src_idx = self._get_src_permutation_idx(indices)
        src_boxes = outputs['pred_boxes'][batch_idx, src_idx]               # [M, 4]
        target_boxes = jnp.concatenate(
            [jnp.asarray(t['boxes'])[np.asarray(i, dtype=np.int64)]
             for t, (_, i) in zip(targets, indices)], axis=0)               # [M, 4]

        l1_sum, giou_sum, xy_sum, hw_sum = _box_loss_call(src_boxes, target_boxes)
        return {
            'loss_bbox': l1_sum / num_boxes,
            'loss_giou': giou_sum / num_boxes,
            'loss_xy': xy_sum / num_boxes,
            'loss_hw': hw_sum / num_boxes,
        }

    def loss_masks(self, outputs, targets, indices, num_boxes):
        # TODO(synk): bilinear `interpolate` of predicted masks to the target resolution
        # is not ported; synthetic targets are generated at the prediction resolution so
        # the resample is the identity here.
        # TODO(synk): the src-mask gather uses an XLA gather instead of an in-kernel
        # scalar-prefetch gather; the ragged target masks must be concatenated host-side
        # anyway, so this keeps the code simple at a small extra HBM copy of [M,H,W].
        src_batch, src_idx = self._get_src_permutation_idx(indices)
        src_masks = outputs['pred_masks'][src_batch, src_idx]               # [M, H, W]
        target_masks = jnp.concatenate(
            [jnp.asarray(t['masks'])[np.asarray(tgt, dtype=np.int64)]
             for t, (_, tgt) in zip(targets, indices)], axis=0)             # [M, H, W]

        src_flat = src_masks.reshape(src_masks.shape[0], -1)
        tgt_flat = target_masks.reshape(src_flat.shape).astype(src_flat.dtype)

        # fused focal + dice: single pass over the mask tensors, sigmoid computed once
        focal_sum, dice_sum = _mask_loss_call(src_flat, tgt_flat, alpha=0.25, gamma=2.0)
        hw = src_flat.shape[1]
        return {
            'loss_mask': focal_sum / hw / num_boxes,   # loss.mean(1).sum() / num_boxes
            'loss_dice': dice_sum / num_boxes,
        }

    def get_loss(self, loss, outputs, targets, indices, num_boxes, **kwargs):
        loss_map = {'labels': self.loss_labels, 'cardinality': self.loss_cardinality,
                    'boxes': self.loss_boxes, 'masks': self.loss_masks}
        assert loss in loss_map, f'do you really want to compute {loss} loss?'
        return loss_map[loss](outputs, targets, indices, num_boxes, **kwargs)

    def forward(self, outputs, targets, return_indices=False):
        indices = self.matcher(outputs, targets)
        num_boxes = sum(len(t['labels']) for t in targets)
        num_boxes = max(float(num_boxes), 1.0)   # single host, world_size == 1
        losses = {}
        for loss in self.losses:
            losses.update(self.get_loss(loss, outputs, targets, indices, num_boxes))
        if return_indices:
            return losses, [indices]
        return losses

    __call__ = forward


# ----------------------------------------------------------------------------
# Matcher substitute
# ----------------------------------------------------------------------------
def trivial_matcher(outputs, targets):
    # TODO(synk): the Hungarian matcher (scipy.optimize.linear_sum_assignment)
    # has no Pallas/TPU equivalent; identity matching is used for this synthetic test.
    return [(np.arange(len(t['labels']), dtype=np.int64),
             np.arange(len(t['labels']), dtype=np.int64)) for t in targets]


# ----------------------------------------------------------------------------
# Main
# ----------------------------------------------------------------------------
if __name__ == "__main__":
    B, Q, NUM_CLASSES, H, W = 2, 8, 4, 16, 16
    key = jax.random.PRNGKey(0)
    k = jax.random.split(key, 8)

    outputs = {
        'pred_logits': jax.random.normal(k[0], (B, Q, NUM_CLASSES), dtype=jnp.float32),
        'pred_boxes': jax.nn.sigmoid(jax.random.normal(k[1], (B, Q, 4), dtype=jnp.float32)),
        'pred_masks': jax.random.normal(k[2], (B, Q, H, W), dtype=jnp.float32),
    }

    n_tgt = [3, 2]
    targets = []
    for b in range(B):
        kk = jax.random.split(k[3 + b], 4)
        n = n_tgt[b]
        ctr = 0.2 + 0.6 * jax.random.uniform(kk[0], (n, 2), dtype=jnp.float32)
        wh = 0.1 + 0.4 * jax.random.uniform(kk[1], (n, 2), dtype=jnp.float32)
        targets.append({
            'labels': np.asarray(jax.random.randint(kk[2], (n,), 0, NUM_CLASSES)),
            'boxes': jnp.concatenate([ctr, wh], axis=1),
            'masks': (jax.random.uniform(kk[3], (n, H, W)) > 0.5).astype(jnp.float32),
        })

    weight_dict = {'loss_ce': 2.0, 'loss_bbox': 5.0, 'loss_giou': 2.0,
                   'loss_mask': 1.0, 'loss_dice': 1.0}
    criterion = SetCriterion(
        num_classes=NUM_CLASSES, matcher=trivial_matcher, weight_dict=weight_dict,
        focal_alpha=0.25, gamma=2.0,
        losses=['labels', 'cardinality', 'boxes', 'masks'],
        image_size=(H, W))

    losses = criterion(outputs, targets)
    losses = {name: jax.block_until_ready(val) for name, val in losses.items()}
    for name, val in losses.items():
        assert np.isfinite(np.asarray(val)).all(), f"non-finite loss {name}"
    print("KERNEL_OK")
</pallas_src>

<mosaic_0001>
module attributes {stable_mosaic.version = 11 : i64} {
  func.func @_focal_cls_kernel(%arg0: i32, %arg1: memref<16x4xf32, #tpu.memory_space<vmem>>, %arg2: memref<16x1xi32, #tpu.memory_space<vmem>>, %arg3: memref<1x1xf32, #tpu.memory_space<vmem>>) attributes {dimension_semantics = [#tpu.dimension_semantics<arbitrary>], iteration_bounds = array<i64: 1>, scalar_prefetch = 0 : i64, scratch_operands = 0 : i64, tpu.core_type = #tpu.core_type<tc>, window_params = [{transform_indices = @transform_0, window_bounds = array<i64: 16, 4>}, {transform_indices = @transform_1, window_bounds = array<i64: 16, 1>}, {pipeline_mode = #tpu.pipeline_mode<synchronous>, transform_indices = @transform_2, window_bounds = array<i64: 1, 1>}]} {
    %c0_i32 = arith.constant 0 : i32
    %0 = arith.cmpi eq, %arg0, %c0_i32 : i32
    %1 = arith.extui %0 : i1 to i32
    %c0_i32_0 = arith.constant 0 : i32
    %2 = arith.cmpi ne, %1, %c0_i32_0 : i32
    scf.if %2 {
      %cst_20 = arith.constant 0.000000e+00 : f32
      %55 = vector.broadcast %cst_20 : f32 to vector<1x1xf32>
      %c0_21 = arith.constant 0 : index
      %c0_22 = arith.constant 0 : index
      %56 = vector.load %arg3[%c0_21, %c0_22] : memref<1x1xf32, #tpu.memory_space<vmem>>, vector<1x1xf32>
      tpu.vector_store %arg3[%c0_21, %c0_22], %55 {strides = array<i32>} : memref<1x1xf32, #tpu.memory_space<vmem>>, vector<1x1xf32>,
    } else {
    }
    %c0 = arith.constant 0 : index
    %c0_1 = arith.constant 0 : index
    %3 = vector.load %arg1[%c0, %c0_1] : memref<16x4xf32, #tpu.memory_space<vmem>>, vector<16x4xf32>
    %c0_2 = arith.constant 0 : index
    %c0_3 = arith.constant 0 : index
    %4 = vector.load %arg2[%c0_2, %c0_3] : memref<16x1xi32, #tpu.memory_space<vmem>>, vector<16x1xi32>
    %5 = tpu.iota {dimensions = array<i32: 1>} : vector<16x4xi32>
    %6 = vector.broadcast %4 : vector<16x1xi32> to vector<16x4xi32>
    %7 = arith.cmpi eq, %5, %6 : vector<16x4xi32>
    %8 = arith.extui %7 : vector<16x4xi1> to vector<16x4xi32>
    %9 = arith.sitofp %8 : vector<16x4xi32> to vector<16x4xf32>
    %10 = math.absf %3 : vector<16x4xf32>
    %cst = arith.constant 0.000000e+00 : f32
    %11 = vector.broadcast %cst : f32 to vector<16x4xf32>
    %12 = arith.subf %11, %10 : vector<16x4xf32>
    %13 = math.exp %12 : vector<16x4xf32>
    %cst_4 = arith.constant 1.000000e+00 : f32
    %14 = vector.broadcast %cst_4 : f32 to vector<16x4xf32>
    %15 = arith.addf %14, %13 : vector<16x4xf32>
    %16 = tpu.reciprocal %15 {approx = true} : vector<16x4xf32> -> vector<16x4xf32>
    %cst_5 = arith.constant 0.000000e+00 : f32
    %17 = vector.broadcast %cst_5 : f32 to vector<16x4xf32>
    %18 = arith.cmpf oge, %3, %17 : vector<16x4xf32>
    %19 = arith.mulf %13, %16 : vector<16x4xf32>
    %20 = arith.select %18, %16, %19 : vector<16x4xi1>, vector<16x4xf32>
    %cst_6 = arith.constant 0.000000e+00 : f32
    %21 = vector.broadcast %cst_6 : f32 to vector<16x4xf32>
    %22 = arith.maximumf %3, %21 : vector<16x4xf32>
    %23 = arith.mulf %3, %9 : vector<16x4xf32>
    %24 = arith.subf %22, %23 : vector<16x4xf32>
    %cst_7 = arith.constant 1.000000e+00 : f32
    %25 = vector.broadcast %cst_7 : f32 to vector<16x4xf32>
    %26 = arith.addf %25, %13 : vector<16x4xf32>
    %27 = math.log %26 : vector<16x4xf32>
    %28 = arith.addf %24, %27 : vector<16x4xf32>
    %29 = arith.mulf %20, %9 : vector<16x4xf32>
    %cst_8 = arith.constant 1.000000e+00 : f32
    %30 = vector.broadcast %cst_8 : f32 to vector<16x4xf32>
    %31 = arith.subf %30, %20 : vector<16x4xf32>
    %cst_9 = arith.constant 1.000000e+00 : f32
    %32 = vector.broadcast %cst_9 : f32 to vector<16x4xf32>
    %33 = arith.subf %32, %9 : vector<16x4xf32>
    %34 = arith.mulf %31, %33 : vector<16x4xf32>
    %35 = arith.addf %29, %34 : vector<16x4xf32>
    %cst_10 = arith.constant 1.000000e+00 : f32
    %36 = vector.broadcast %cst_10 : f32 to vector<16x4xf32>
    %37 = arith.subf %36, %35 : vector<16x4xf32>
    %38 = arith.mulf %37, %37 : vector<16x4xf32>
    %39 = arith.mulf %28, %38 : vector<16x4xf32>
    %cst_11 = arith.constant 2.500000e-01 : f32
    %40 = vector.broadcast %cst_11 : f32 to vector<16x4xf32>
    %41 = arith.mulf %40, %9 : vector<16x4xf32>
    %cst_12 = arith.constant 1.000000e+00 : f32
    %42 = vector.broadcast %cst_12 : f32 to vector<16x4xf32>
    %43 = arith.subf %42, %9 : vector<16x4xf32>
    %cst_13 = arith.constant 7.500000e-01 : f32
    %44 = vector.broadcast %cst_13 : f32 to vector<16x4xf32>
    %45 = arith.mulf %44, %43 : vector<16x4xf32>
    %46 = arith.addf %41, %45 : vector<16x4xf32>
    %47 = arith.mulf %46, %39 : vector<16x4xf32>
    %c0_14 = arith.constant 0 : index
    %c0_15 = arith.constant 0 : index
    %48 = vector.load %arg3[%c0_14, %c0_15] : memref<1x1xf32, #tpu.memory_space<vmem>>, vector<1x1xf32>
    %cst_16 = arith.constant dense<0.000000e+00> : vector<16xf32>
    %49 = vector.multi_reduction <add>, %47, %cst_16 [1] : vector<16x4xf32> to vector<16xf32>
    %50 = vector.shape_cast %49 : vector<16xf32> to vector<16x1xf32>
    %cst_17 = arith.constant dense<0.000000e+00> : vector<1xf32>
    %51 = vector.multi_reduction <add>, %50, %cst_17 [0] : vector<16x1xf32> to vector<1xf32>
    %52 = vector.shape_cast %51 : vector<1xf32> to vector<1x1xf32>
    %53 = arith.addf %48, %52 : vector<1x1xf32>
    %c0_18 = arith.constant 0 : index
    %c0_19 = arith.constant 0 : index
    %54 = vector.load %arg3[%c0_18, %c0_19] : memref<1x1xf32, #tpu.memory_space<vmem>>, vector<1x1xf32>
    tpu.vector_store %arg3[%c0_18, %c0_19], %53 {strides = array<i32>} : memref<1x1xf32, #tpu.memory_space<vmem>>, vector<1x1xf32>,
    return
  }
  func.func @transform_0(%arg0: i32) -> (i32, i32) {
    %c0_i32 = arith.constant 0 : i32
    %c0_i32_0 = arith.constant 0 : i32
    return %arg0, %c0_i32 : i32, i32
  }
  func.func @transform_1(%arg0: i32) -> (i32, i32) {
    %c0_i32 = arith.constant 0 : i32
    %c0_i32_0 = arith.constant 0 : i32
    return %arg0, %c0_i32 : i32, i32
  }
  func.func @transform_2(%arg0: i32) -> (i32, i32) {
    %c0_i32 = arith.constant 0 : i32
    %c0_i32_0 = arith.constant 0 : i32
    %c0_i32_1 = arith.constant 0 : i32
    return %c0_i32, %c0_i32_0 : i32, i32
  }
}

</mosaic_0001>

<bundles_post_ra>
// kernel: tpu_custom_call.1
= control target key start
LH: loop header
LB: loop body
LE: loop exit
PB: predicated region body
PF: predicated region fallthrough
CT: control target
= control target key end

     0   :  { %v164_v1 = vmov 0   ;;  %s208_s0 = inlined_call_operand.vmem [shape: f32[16,4], index: 0, kind: input, shape index: {}]   ;;  %s209_s1 = inlined_call_operand.vmem [shape: s32[16,1], index: 1, kind: input, shape index: {}]   ;;  %s210_s2 = inlined_call_operand.hbm [shape: f32[1,1], index: 2, kind: output, shape index: {}]  }
   0x1   :  { %v20_v0 = vld [vmem:[%s209_s1] sm:$0xff]  ;;  %127 = vset.pattern.permute.xlu0 %v164_v1 }
   0x2   :  { %7 = vsyncpa [#allocation3], 0  ;;  %25 = vperm.xlu0 %127, %v20_v0   ;;  %v21_v2 = vld [vmem:[%s209_s1 + $0x8] sm:$0xff]  ;;  %v18_v3 = vld [vmem:[%s208_s0] sm:$0xff]  ;;  %v22_v16 = vlaneseq  ;;  %v165_v24 = vmov 0.0   ;;  %vm91_vm4 = vcmask 31744  }
   0x3   :  { %v36_v4 = vand.u32 2147483647, %v18_v3  ;;  %v19_v5 = vld [vmem:[%s208_s0 + $0x8] sm:$0xff]  ;;  %vm48_vm0 = vcmp.ge.f32.partialorder %v18_v3, 0.0  ;;  %v54_v28 = vmax.f32 %v18_v3, 0.0  ;;  %vm16_vm5 = vcmask 0  }
   0x4   :  { %v37_v7 = vand.u32 2147483647, %v19_v5  ;;  %v23_v19 = vand.u32 127, %v22_v16  ;;  %vm49_vm1 = vcmp.ge.f32.partialorder %v19_v5, 0.0  ;;  %v55_v36 = vmax.f32 %v19_v5, 0.0  ;;  %s166_s0 = smov [#allocation2]  }
   0x5   :  { %v38_v6 = vsub.f32 0.0, %v36_v4  ;;  %17 = vst.msk [vmem:[#allocation2] sm:$0x1] %vm16_vm5, %v165_v24  ;;  %s114_s1 = sshll.u32 %s166_s0, 4  ;;  %s115_s1 = int_to_ptr.vmem [resolvable:$true] %s114_s1 }
   0x6   :  { %28 = vperm.xlu0 %127, %v21_v2   ;;  %v39_v9 = vsub.f32 0.0, %v37_v7  ;;  %s140_s17 = scalar_lea.vmem %s115_s1, 16  ;;  %s144_s18 = scalar_lea.vmem %s115_s1, 32 }
   0x7   :  { %v40_v8 = vmul.f32 1.442695, %v38_v6  ;;  %p141_p0 = scmp.ne.s32.totalorder %s115_s1, %s140_s17  ;;  %p145_p1 = scmp.lt.s32.totalorder %s115_s1, %s115_s1 }
   0x8   :  { %v42_v10 = vmul.f32 1.442695, %v39_v9  ;;  %p146_p2 = scmp.lt.s32.totalorder %s144_s18, %s140_s17 }
   0x9   :  { %128 = vpow2.f32 %v40_v8 }
   0xa   :  { %130 = vpow2.f32 %v42_v10  ;;  %p147_p3 = por %p146_p2, %p145_p1 }
   0xc   :  { %v90_v10 = vld [vmem:[#allocation2] sm:$0x1]  ;;  %p148_p4 = pnand %p147_p3, %p141_p0 }
  0x13   :  { %v129_v11 = vpop.eup %128 }
  0x14   :  { %v44_v12 = vadd.f32 1.0, %v129_v11  ;;  %v131_v13 = vpop.eup %130 }
  0x15   :  { %v45_v14 = vadd.f32 1.0, %v131_v13 }
  0x16   :  { %132 = vrcp.f32 %v44_v12 }
  0x17   :  { %134 = vrcp.f32 %v45_v14 }
  0x18   :  { %136 = vlog2.f32 %v44_v12 }
  0x19   :  { %138 = vlog2.f32 %v45_v14 }
  0x20   :  { %v133_v15 = vpop.eup %132 }
  0x21   :  { %v50_v17 = vmul.f32 %v133_v15, %v129_v11  ;;  %v135_v18 = vpop.eup %134 }
  0x22   :  { %v51_v21 = vmul.f32 %v135_v18, %v131_v13  ;;  %v137_v31 = vpop.eup %136 }
  0x23   :  { %v52_v20 = vsel %vm48_vm0, %v133_v15, %v50_v17  ;;  %v139_v39 = vpop.eup %138  ;;  %v61_v41 = vmul.f32 0.6931472, %v137_v31 }
  0x24   :  { %v68_v23 = vsub.f32 1.0, %v52_v20  ;;  %v53_v26 = vsel %vm49_vm1, %v135_v18, %v51_v21  ;;  %v63_v48 = vmul.f32 0.6931472, %v139_v39 }
  0x25   :  { %v69_v33 = vsub.f32 1.0, %v53_v26 }
  0x81   :  { %v26_v22 = vpop.permute.xlu0 %25 }
  0x82   :  { %vm30_vm2 = vcmp.eq.s32.totalorder %v23_v19, %v26_v22 }
  0x83   :  { %v122_v25 = vsel %vm30_vm2, 1.0, %v165_v24 }
  0x84   :  { %v70_v27 = vsub.f32 1.0, %v122_v25  ;;  %v56_v29 = vmul.f32 %v122_v25, %v18_v3  ;;  %v66_v34 = vmul.f32 %v122_v25, %v52_v20  ;;  %v82_v50 = vmul.f32 0.25, %v122_v25 }
  0x85   :  { %v29_v30 = vpop.permute.xlu0 %28 }
  0x86   :  { %v72_v32 = vmul.f32 %v70_v27, %v68_v23  ;;  %vm31_vm3 = vcmp.eq.s32.totalorder %v23_v19, %v29_v30  ;;  %v58_v40 = vsub.f32 %v54_v28, %v56_v29  ;;  %v84_v46 = vmul.f32 0.75, %v70_v27 }
  0x87   :  { %v123_v35 = vsel %vm31_vm3, 1.0, %v165_v24 }
  0x88   :  { %v57_v37 = vmul.f32 %v123_v35, %v19_v5  ;;  %v71_v38 = vsub.f32 1.0, %v123_v35  ;;  %v74_v42 = vadd.f32 %v72_v32, %v66_v34  ;;  %v67_v43 = vmul.f32 %v123_v35, %v53_v26 }
  0x89   :  { %v64_v51 = vadd.f32 %v61_v41, %v58_v40  ;;  %v86_v56 = vadd.f32 %v84_v46, %v82_v50  ;;  %v83_v57 = vmul.f32 0.25, %v123_v35 }
  0x8a   :  { %v73_v44 = vmul.f32 %v71_v38, %v69_v33  ;;  %v76_v45 = vsub.f32 1.0, %v74_v42  ;;  %v59_v47 = vsub.f32 %v55_v36, %v57_v37  ;;  %v85_v54 = vmul.f32 0.75, %v71_v38 }
  0x8c   :  { %v75_v49 = vadd.f32 %v73_v44, %v67_v43  ;;  %v78_v52 = vmul.f32 %v76_v45, %v76_v45  ;;  %v65_v58 = vadd.f32 %v63_v48, %v59_v47  ;;  %v87_v62 = vadd.f32 %v85_v54, %v83_v57 }
  0x8e   :  { %v77_v53 = vsub.f32 1.0, %v75_v49  ;;  %v80_v55 = vmul.f32 %v78_v52, %v64_v51 }
  0x90   :  { %v79_v59 = vmul.f32 %v77_v53, %v77_v53  ;;  %v88_v60 = vmul.f32 %v86_v56, %v80_v55 }
  0x92   :  { %v81_v61 = vmul.f32 %v79_v59, %v65_v58  ;;  %v92_v63 = vsel %vm91_vm4, %v88_v60, 0.0 }
  0x93   :  { %93 = vadd.xlane.f32.xlu1 %v92_v63 }
  0x94   :  { %v89_v0 = vmul.f32 %v87_v62, %v81_v61 }
  0x96   :  { %v95_v1 = vsel %vm91_vm4, %v89_v0, 0.0 }
  0x97   :  { %96 = vadd.xlane.f32.xlu1 %v95_v1 }
 0x120   :  { %v94_v2 = vpop.xlane.xlu1 %93 }
 0x124   :  { %v97_v3 = vpop.xlane.xlu1 %96 }
 0x125   :  { %v98_v4 = vadd.f32 %v97_v3, %v94_v2 }
 0x127   :  { %v99_v5 = vrot.slane %v98_v4, 4 }
 0x129   :  { %v100_v6 = vadd.f32 %v99_v5, %v98_v4 }
 0x12b   :  { %v101_v7 = vrot.slane %v100_v6, 2 }
 0x12d   :  { %v102_v8 = vadd.f32 %v101_v7, %v100_v6 }
 0x12f   :  { %v103_v9 = vrot.slane %v102_v8, 1 }
 0x131   :  { %v104_v11 = vadd.f32 %v103_v9, %v102_v8 }
 0x133   :  { %v105_v12 = vadd.f32 %v104_v11, %v90_v10 }
 0x135   :  { %107 = vst.msk [vmem:[#allocation2] sm:$0x1] %vm16_vm5, %v105_v12 }
 0x136   :  { %151 = shalt.err (!%p148_p4)
}
 0x137   :  { %s152_s21 = scalar_lea.hbm %s210_s2, 16 }
 0x138   :  { %p153_p5 = scmp.ne.s32.totalorder %s210_s2, %s152_s21  ;;  %p156_p6 = scmp.lt.u32.totalorder %s152_s21, %s210_s2 }
 0x13a   :  { %p158_p7 = pnand %p156_p6, %p153_p5 }
 0x13c   :  { %161 = shalt.err (!%p158_p7)
}
 0x13d   :  { %117 = dma.vmem_to_hbm [thread:$0]  %s115_s1, 16, %s210_s2, [#allocation3]  }
 0x13e   :  { %162 = dma.done.wait [#allocation3], 16  }
 0x13f   :  { %163 = vsyncadd [#allocation3], 4294967280 }
 0x140   :  { %121 = vsyncpa [#allocation3], 1 }

</bundles_post_ra>
